<compile_context>
chip_gen: v7x
topology: tpu7x:2x2x1
jax: 0.10.0
libtpu: 0.0.40
codegen_flags: <defaults>
</compile_context>

<pallas_src>
import math
import numpy as np

import jax
import jax.numpy as jnp
from jax import lax
from jax.experimental import pallas as pl
from jax.experimental.pallas import tpu as pltpu


# ----------------------- kernel 1: LayerNorm + QKV ------------------------- #

def _make_ln_qkv_kernel(TB, H, S, D, Dh, eps=1e-5):
    """LayerNorm + fused QKV projection over a tile of TB*S token rows.
    Emits q/k/v head-major ([TB, H, S, Dh]) so the attention inner loop needs
    no per-neighbor relayout (head split amortised once per row tile)."""
    def kernel(x_ref, g_ref, b_ref, wqkv_ref, bqkv_ref, q_ref, k_ref, v_ref):
        x = x_ref[...]                                        # [TB*S, D]
        mu = jnp.mean(x, axis=-1, keepdims=True)
        var = jnp.mean((x - mu) ** 2, axis=-1, keepdims=True)
        xn = (x - mu) * lax.rsqrt(var + eps)
        xn = xn * g_ref[...] + b_ref[...]
        qkv = jnp.dot(xn, wqkv_ref[...],
                      preferred_element_type=jnp.float32) + bqkv_ref[...]
        for h in range(H):
            q_ref[:, h, :, :] = qkv[:, h * Dh:(h + 1) * Dh].reshape(TB, S, Dh)
            k_ref[:, h, :, :] = qkv[:, D + h * Dh:D + (h + 1) * Dh].reshape(TB, S, Dh)
            v_ref[:, h, :, :] = qkv[:, 2 * D + h * Dh:2 * D + (h + 1) * Dh].reshape(TB, S, Dh)
    return kernel


# --------------------- kernel 2: CSR graph attention ----------------------- #

def _make_attn_kernel(H, S, D, Dh):
    """Per query node i: loop over its CSR neighbors, double-buffered K/V DMA
    from HBM, all heads batched per einsum, accumulator kept as a loop carry."""
    scale = 1.0 / math.sqrt(Dh)
    NEG = -1e30

    def kernel(row_off_ref, col_ids_ref, klen_ref,      # scalar prefetch (SMEM)
               w_csr_ref,                               # SMEM edge weights
               q_ref, k_hbm, v_hbm,                     # q tile (VMEM), K/V (HBM)
               o_ref,                                   # out tile (VMEM)
               kbuf, vbuf, sem):                        # scratch
        i = pl.program_id(0)
        start = row_off_ref[i]
        deg = row_off_ref[i + 1] - start

        qh = q_ref[0] * scale                           # [H, S, Dh]
        kcol = lax.broadcasted_iota(jnp.int32, (1, 1, S), 2)

        def fetch(e, slot):
            j = col_ids_ref[start + e]
            pltpu.make_async_copy(k_hbm.at[j], kbuf.at[slot], sem.at[0, slot]).start()
            pltpu.make_async_copy(v_hbm.at[j], vbuf.at[slot], sem.at[1, slot]).start()

        @pl.when(deg > 0)
        def _():
            fetch(0, 0)

        def body(e, acc):
            slot = e % 2
            # scalar reads before the DMA waits (keep sst->sld forwarding)
            j = col_ids_ref[start + e]
            w_ij = w_csr_ref[start + e]
            klen_j = klen_ref[j]

            pltpu.make_async_copy(k_hbm.at[0], kbuf.at[slot], sem.at[0, slot]).wait()
            pltpu.make_async_copy(v_hbm.at[0], vbuf.at[slot], sem.at[1, slot]).wait()

            @pl.when(e + 1 < deg)
            def _():
                fetch(e + 1, 1 - slot)

            k = kbuf[slot]                              # [H, S, Dh]
            v = vbuf[slot]                              # [H, S, Dh]
            s = jnp.einsum('hqd,hkd->hqk', qh, k,
                           preferred_element_type=jnp.float32)   # [H, S, S]
            s = s + w_ij                                # edge weight (softmax-shift invariant)
            kmask = kcol < klen_j                       # valid-key mask [1, 1, S]
            s = jnp.where(kmask, s, NEG)
            m = jnp.max(s, axis=-1, keepdims=True)
            p = jnp.where(kmask, jnp.exp(s - m), 0.0)
            denom = jnp.maximum(jnp.sum(p, axis=-1, keepdims=True), 1e-30)
            av = jnp.einsum('hqk,hkd->hqd', p / denom, v,
                            preferred_element_type=jnp.float32)  # [H, S, Dh]
            return acc + av

        acc = lax.fori_loop(0, deg, body, jnp.zeros((H, S, Dh), jnp.float32))
        o_ref[0] = acc
    return kernel


# ------------- kernel 3: output projection + residual + mask --------------- #

def _make_out_proj_kernel(TB, H, S, D, Dh):
    def kernel(a_ref, x_ref, m_ref, wo_ref, bo_ref, y_ref):
        a = a_ref[...]                                  # [TB, H, S, Dh]
        a2d = jnp.concatenate(
            [a[:, h].reshape(TB * S, Dh) for h in range(H)], axis=-1)  # [TB*S, D]
        y = jnp.dot(a2d, wo_ref[...],
                    preferred_element_type=jnp.float32) + bo_ref[...]
        y_ref[...] = (y + x_ref[...]) * m_ref[...]
    return kernel


# ----------------------------- wrapper ------------------------------------ #

def multi_head_attention_with_mask(params, node_features, node_masks,
                                   edge_index, edge_type=None, num_heads=4):
    x = jnp.asarray(node_features, jnp.float32)
    mask = jnp.asarray(node_masks, jnp.float32)
    N, S, D = x.shape
    H = num_heads
    assert D % H == 0
    Dh = D // H

    ei = np.asarray(edge_index)
    if N == 0 or ei.size == 0:
        return jnp.zeros_like(x)

    # ---- pad the sequence length to a sublane multiple (8) ----
    S_p = ((S + 7) // 8) * 8
    if S_p != S:
        x = jnp.pad(x, ((0, 0), (0, S_p - S), (0, 0)))
        mask = jnp.pad(mask, ((0, 0), (0, S_p - S)))

    klen = jnp.sum(mask, axis=1).astype(jnp.int32)        # valid tokens / node

    # ---- per-edge weights (softplus of edge-type parameter, clipped) ----
    n_edges = ei.shape[1]
    if edge_type is not None:
        w_all = jax.nn.softplus(params["edge_type_weights"][jnp.asarray(edge_type) - 1])
        w_all = jnp.clip(w_all, 1e-6, 1e6).astype(jnp.float32)
    else:
        w_all = jnp.ones((n_edges,), jnp.float32)

    # ---- CSR adjacency (host side; duplicate (src,dst) keeps the last edge) ----
    src_np, dst_np = ei[0], ei[1]
    last = {}
    for e in range(n_edges):
        last[(int(src_np[e]), int(dst_np[e]))] = e
    rows = [[] for _ in range(N)]
    for (s_, d_), e in last.items():
        rows[s_].append((d_, e))
    col_ids_np, edge_sel_np, row_off_np = [], [], [0]
    for s_ in range(N):
        rows[s_].sort()
        for d_, e in rows[s_]:
            col_ids_np.append(d_)
            edge_sel_np.append(e)
        row_off_np.append(len(col_ids_np))
    E = len(col_ids_np)

    # ---- row tiling over all N*S_p token rows ----
    total = N * S_p
    tile = min(512, total)
    tile = ((tile + S_p - 1) // S_p) * S_p                # multiple of S_p (and 8)
    padded = ((total + tile - 1) // tile) * tile
    n_node_steps = padded // S_p                          # >= N (padding nodes)
    TB = tile // S_p                                      # nodes per row tile

    x2d = x.reshape(total, D)
    mask2d = mask.reshape(total, 1)
    if padded != total:
        x2d = jnp.pad(x2d, ((0, padded - total), (0, 0)))
        mask2d = jnp.pad(mask2d, ((0, padded - total), (0, 0)))

    # pad row offsets so padding nodes have degree 0
    row_off_np = row_off_np + [E] * (n_node_steps + 1 - len(row_off_np))
    row_off = jnp.asarray(row_off_np, jnp.int32)
    col_ids = jnp.asarray(col_ids_np, jnp.int32)
    w_csr = w_all[jnp.asarray(edge_sel_np, jnp.int32)]

    # ---- fused weights: torch Linear weight is [out, in] -> use W.T ----
    w_qkv = jnp.concatenate([params["wq"].T, params["wk"].T, params["wv"].T],
                            axis=1).astype(jnp.float32)   # [D, 3D]
    b_qkv = jnp.concatenate([params["bq"], params["bk"], params["bv"]]
                            ).reshape(1, 3 * D).astype(jnp.float32)
    wo_t = params["wo"].T.astype(jnp.float32)             # [D, D]
    bo2 = params["bo"].reshape(1, D).astype(jnp.float32)
    ln_g = params["ln_g"].reshape(1, D).astype(jnp.float32)
    ln_b = params["ln_b"].reshape(1, D).astype(jnp.float32)

    cp = pltpu.CompilerParams(dimension_semantics=("parallel",),
                              vmem_limit_bytes=32 * 1024 * 1024)

    # ---- kernel 1: LayerNorm + fused QKV projection + head split ----
    q_h, k_h, v_h = pl.pallas_call(
        _make_ln_qkv_kernel(TB, H, S_p, D, Dh),
        out_shape=(
            jax.ShapeDtypeStruct((n_node_steps, H, S_p, Dh), jnp.float32),
            jax.ShapeDtypeStruct((n_node_steps, H, S_p, Dh), jnp.float32),
            jax.ShapeDtypeStruct((n_node_steps, H, S_p, Dh), jnp.float32),
        ),
        grid=(padded // tile,),
        in_specs=[
            pl.BlockSpec((tile, D), lambda i: (i, 0)),        # x rows
            pl.BlockSpec((1, D), lambda i: (0, 0)),           # LN gamma
            pl.BlockSpec((1, D), lambda i: (0, 0)),           # LN beta
            pl.BlockSpec((D, 3 * D), lambda i: (0, 0)),       # W_qkv
            pl.BlockSpec((1, 3 * D), lambda i: (0, 0)),       # b_qkv
        ],
        out_specs=(
            pl.BlockSpec((TB, H, S_p, Dh), lambda i: (i, 0, 0, 0)),
            pl.BlockSpec((TB, H, S_p, Dh), lambda i: (i, 0, 0, 0)),
            pl.BlockSpec((TB, H, S_p, Dh), lambda i: (i, 0, 0, 0)),
        ),
        compiler_params=cp,
    )(x2d, ln_g, ln_b, w_qkv, b_qkv)

    # ---- kernel 2: CSR graph attention (K/V in HBM, manual DMA per neighbor) ----
    attn_h = pl.pallas_call(
        _make_attn_kernel(H, S_p, D, Dh),
        out_shape=jax.ShapeDtypeStruct((n_node_steps, H, S_p, Dh), jnp.float32),
        grid_spec=pltpu.PrefetchScalarGridSpec(
            num_scalar_prefetch=3,                            # row_off, col_ids, klen
            grid=(n_node_steps,),
            in_specs=[
                pl.BlockSpec(memory_space=pltpu.MemorySpace.SMEM),          # w_csr
                pl.BlockSpec((1, H, S_p, Dh), lambda i, *_: (i, 0, 0, 0)),  # q
                pl.BlockSpec(memory_space=pl.ANY),                          # K (HBM)
                pl.BlockSpec(memory_space=pl.ANY),                          # V (HBM)
            ],
            out_specs=pl.BlockSpec((1, H, S_p, Dh), lambda i, *_: (i, 0, 0, 0)),
            scratch_shapes=[
                pltpu.VMEM((2, H, S_p, Dh), jnp.float32),     # K double buffer
                pltpu.VMEM((2, H, S_p, Dh), jnp.float32),     # V double buffer
                pltpu.SemaphoreType.DMA((2, 2)),
            ],
        ),
        compiler_params=cp,
    )(row_off, col_ids, klen, w_csr, q_h, k_h, v_h)

    # ---- kernel 3: output projection + bias + residual + token mask ----
    y2d = pl.pallas_call(
        _make_out_proj_kernel(TB, H, S_p, D, Dh),
        out_shape=jax.ShapeDtypeStruct((padded, D), jnp.float32),
        grid=(padded // tile,),
        in_specs=[
            pl.BlockSpec((TB, H, S_p, Dh), lambda i: (i, 0, 0, 0)),  # attn
            pl.BlockSpec((tile, D), lambda i: (i, 0)),               # residual x
            pl.BlockSpec((tile, 1), lambda i: (i, 0)),               # token mask
            pl.BlockSpec((D, D), lambda i: (0, 0)),                  # Wo
            pl.BlockSpec((1, D), lambda i: (0, 0)),                  # bo
        ],
        out_specs=pl.BlockSpec((tile, D), lambda i: (i, 0)),
        compiler_params=cp,
    )(attn_h, x2d, mask2d, wo_t, bo2)

    out = y2d[:total].reshape(N, S_p, D)
    return out[:, :S, :]


# ------------------------ pure numpy reference ----------------------------- #

def reference_forward(params, x, mask, edge_index, edge_type, num_heads):
    x = np.asarray(x, np.float64)
    mask = np.asarray(mask, np.float64)
    N, S, D = x.shape
    H = num_heads
    Dh = D // H
    p = {kk: np.asarray(vv, np.float64) for kk, vv in params.items()}

    adj = np.full((N, N), -np.inf)
    src, dst = np.asarray(edge_index)
    if edge_type is not None:
        et = np.asarray(edge_type)
        for e in range(src.shape[0]):
            w = np.log1p(np.exp(p["edge_type_weights"][et[e] - 1]))
            adj[src[e], dst[e]] = min(max(w, 1e-6), 1e6)
    else:
        adj[src, dst] = 1.0

    mu = x.mean(-1, keepdims=True)
    var = ((x - mu) ** 2).mean(-1, keepdims=True)
    xn = (x - mu) / np.sqrt(var + 1e-5) * p["ln_g"] + p["ln_b"]
    q = xn @ p["wq"].T + p["bq"]
    k = xn @ p["wk"].T + p["bk"]
    v = xn @ p["wv"].T + p["bv"]
    q = q.reshape(N, S, H, Dh).transpose(0, 2, 1, 3)
    k = k.reshape(N, S, H, Dh).transpose(0, 2, 1, 3)
    v = v.reshape(N, S, H, Dh).transpose(0, 2, 1, 3)

    vlen = mask.sum(1).astype(int)
    outf = np.zeros_like(q)
    for i in range(N):
        if vlen[i] == 0:
            continue
        att = [j for j in range(N) if adj[i, j] != -np.inf]
        if not att:
            continue
        for h in range(H):
            qv = q[i, h, :vlen[i]]
            for j in att:
                kl = vlen[j]
                if kl == 0:
                    continue
                sc = qv @ k[j, h, :kl].T / np.sqrt(Dh) + adj[i, j]
                sc = sc - sc.max(axis=1, keepdims=True)
                e = np.exp(sc)
                aw = e / e.sum(axis=1, keepdims=True)
                outf[i, h, :vlen[i]] += aw @ v[j, h, :kl]
    outf = outf.transpose(0, 2, 1, 3).reshape(N, S, D)
    out = outf @ p["wo"].T + p["bo"]
    out = out + x
    out = out * mask[:, :, None]
    return out


# --------------------------------- main ------------------------------------ #

if __name__ == "__main__":
    N, S, D, H = 8, 8, 32, 4
    NUM_EDGE_TYPES = 4

    key = jax.random.PRNGKey(0)
    kx, kq, kk_, kv_, ko, kbq, kbk, kbv, kbo = jax.random.split(key, 9)

    def lin(kw, kb, fan_in, fan_out):
        bound = 1.0 / np.sqrt(fan_in)
        W = jax.random.uniform(kw, (fan_out, fan_in), jnp.float32, -bound, bound)
        b = jax.random.uniform(kb, (fan_out,), jnp.float32, -bound, bound)
        return W, b

    wq, bq = lin(kq, kbq, D, D)
    wk, bk = lin(kk_, kbk, D, D)
    wv, bv = lin(kv_, kbv, D, D)
    wo, bo = lin(ko, kbo, D, D)
    params = dict(
        edge_type_weights=jnp.ones((NUM_EDGE_TYPES,), jnp.float32),
        ln_g=jnp.ones((D,), jnp.float32),
        ln_b=jnp.zeros((D,), jnp.float32),
        wq=wq, bq=bq, wk=wk, bk=bk, wv=wv, bv=bv, wo=wo, bo=bo,
    )

    node_features = jax.random.normal(kx, (N, S, D), jnp.float32)
    lens = np.array([8, 5, 3, 8, 1, 0, 7, 2], np.int32)      # valid prefix lengths
    node_masks = jnp.asarray(
        (np.arange(S)[None, :] < lens[:, None]).astype(np.float32))
    edges = np.array([[0, 1, 1, 2, 3, 4, 5, 6, 0, 2, 7, 3],
                      [1, 0, 2, 3, 1, 5, 4, 7, 2, 0, 6, 3]], np.int32)
    edge_types_np = np.array([1, 2, 3, 4, 1, 2, 3, 4, 1, 2, 3, 4], np.int32)

    out = multi_head_attention_with_mask(
        params, node_features, node_masks,
        jnp.asarray(edges), jnp.asarray(edge_types_np), num_heads=H)
    out = jax.block_until_ready(out)

    ref = reference_forward(params, node_features, node_masks,
                            edges, edge_types_np, H)
    np.testing.assert_allclose(np.asarray(out), ref, rtol=5e-3, atol=5e-3)
    print("KERNEL_OK")
</pallas_src>

<mosaic_0001>
module attributes {stable_mosaic.version = 11 : i64} {
  func.func @kernel(%arg0: i32, %arg1: memref<64x32xf32, #tpu.memory_space<vmem>>, %arg2: memref<1x32xf32, #tpu.memory_space<vmem>>, %arg3: memref<1x32xf32, #tpu.memory_space<vmem>>, %arg4: memref<32x96xf32, #tpu.memory_space<vmem>>, %arg5: memref<1x96xf32, #tpu.memory_space<vmem>>, %arg6: memref<8x4x8x8xf32, #tpu.memory_space<vmem>>, %arg7: memref<8x4x8x8xf32, #tpu.memory_space<vmem>>, %arg8: memref<8x4x8x8xf32, #tpu.memory_space<vmem>>) attributes {dimension_semantics = [#tpu.dimension_semantics<parallel>], iteration_bounds = array<i64: 1>, scalar_prefetch = 0 : i64, scratch_operands = 0 : i64, tpu.core_type = #tpu.core_type<tc>, window_params = [{transform_indices = @transform_0, window_bounds = array<i64: 64, 32>}, {pipeline_mode = #tpu.pipeline_mode<synchronous>, transform_indices = @transform_1, window_bounds = array<i64: 1, 32>}, {pipeline_mode = #tpu.pipeline_mode<synchronous>, transform_indices = @transform_2, window_bounds = array<i64: 1, 32>}, {pipeline_mode = #tpu.pipeline_mode<synchronous>, transform_indices = @transform_3, window_bounds = array<i64: 32, 96>}, {pipeline_mode = #tpu.pipeline_mode<synchronous>, transform_indices = @transform_4, window_bounds = array<i64: 1, 96>}, {transform_indices = @transform_5, window_bounds = array<i64: 8, 4, 8, 8>}, {transform_indices = @transform_6, window_bounds = array<i64: 8, 4, 8, 8>}, {transform_indices = @transform_7, window_bounds = array<i64: 8, 4, 8, 8>}]} {
    %c0 = arith.constant 0 : index
    %c0_0 = arith.constant 0 : index
    %0 = vector.load %arg1[%c0, %c0_0] : memref<64x32xf32, #tpu.memory_space<vmem>>, vector<64x32xf32>
    %cst = arith.constant dense<0.000000e+00> : vector<64xf32>
    %1 = vector.multi_reduction <add>, %0, %cst [1] : vector<64x32xf32> to vector<64xf32>
    %2 = vector.shape_cast %1 : vector<64xf32> to vector<64x1xf32>
    %cst_1 = arith.constant 3.200000e+01 : f32
    %3 = vector.broadcast %cst_1 : f32 to vector<64x1xf32>
    %4 = arith.divf %2, %3 : vector<64x1xf32>
    %5 = vector.broadcast %4 : vector<64x1xf32> to vector<64x32xf32>
    %6 = arith.subf %0, %5 : vector<64x32xf32>
    %7 = arith.mulf %6, %6 : vector<64x32xf32>
    %cst_2 = arith.constant dense<0.000000e+00> : vector<64xf32>
    %8 = vector.multi_reduction <add>, %7, %cst_2 [1] : vector<64x32xf32> to vector<64xf32>
    %9 = vector.shape_cast %8 : vector<64xf32> to vector<64x1xf32>
    %cst_3 = arith.constant 3.200000e+01 : f32
    %10 = vector.broadcast %cst_3 : f32 to vector<64x1xf32>
    %11 = arith.divf %9, %10 : vector<64x1xf32>
    %12 = vector.broadcast %4 : vector<64x1xf32> to vector<64x32xf32>
    %13 = arith.subf %0, %12 : vector<64x32xf32>
    %cst_4 = arith.constant 9.99999974E-6 : f32
    %14 = vector.broadcast %cst_4 : f32 to vector<64x1xf32>
    %15 = arith.addf %11, %14 : vector<64x1xf32>
    %16 = math.rsqrt %15 : vector<64x1xf32>
    %17 = vector.broadcast %16 : vector<64x1xf32> to vector<64x32xf32>
    %18 = arith.mulf %13, %17 : vector<64x32xf32>
    %c0_5 = arith.constant 0 : index
    %c0_6 = arith.constant 0 : index
    %19 = vector.load %arg2[%c0_5, %c0_6] : memref<1x32xf32, #tpu.memory_space<vmem>>, vector<1x32xf32>
    %20 = vector.broadcast %19 : vector<1x32xf32> to vector<64x32xf32>
    %21 = arith.mulf %18, %20 : vector<64x32xf32>
    %c0_7 = arith.constant 0 : index
    %c0_8 = arith.constant 0 : index
    %22 = vector.load %arg3[%c0_7, %c0_8] : memref<1x32xf32, #tpu.memory_space<vmem>>, vector<1x32xf32>
    %23 = vector.broadcast %22 : vector<1x32xf32> to vector<64x32xf32>
    %24 = arith.addf %21, %23 : vector<64x32xf32>
    %c0_9 = arith.constant 0 : index
    %c0_10 = arith.constant 0 : index
    %25 = vector.load %arg4[%c0_9, %c0_10] : memref<32x96xf32, #tpu.memory_space<vmem>>, vector<32x96xf32>
    %cst_11 = arith.constant dense<0.000000e+00> : vector<64x96xf32>
    %26 = tpu.matmul %24, %25, %cst_11 {dimension_numbers = #tpu.dot_dimension_numbers<[1], [0], [0], [1], [0, 0, 1, 1], [], []>} : vector<64x32xf32>, vector<32x96xf32>, vector<64x96xf32> -> vector<64x96xf32>
    %c0_12 = arith.constant 0 : index
    %c0_13 = arith.constant 0 : index
    %27 = vector.load %arg5[%c0_12, %c0_13] : memref<1x96xf32, #tpu.memory_space<vmem>>, vector<1x96xf32>
    %28 = vector.broadcast %27 : vector<1x96xf32> to vector<64x96xf32>
    %29 = arith.addf %26, %28 : vector<64x96xf32>
    %30 = vector.extract_strided_slice %29 {offsets = [0, 0], sizes = [64, 8], strides = [1, 1]} : vector<64x96xf32> to vector<64x8xf32>
    %31 = vector.shape_cast %30 : vector<64x8xf32> to vector<8x8x8xf32>
    %c0_14 = arith.constant 0 : index
    %c0_15 = arith.constant 0 : index
    %c0_16 = arith.constant 0 : index
    %c0_17 = arith.constant 0 : index
    %32 = vector.load %arg6[%c0_14, %c0_15, %c0_16, %c0_17] : memref<8x4x8x8xf32, #tpu.memory_space<vmem>>, vector<8x1x8x8xf32>
    %33 = vector.shape_cast %32 : vector<8x1x8x8xf32> to vector<8x8x8xf32>
    %34 = vector.shape_cast %31 : vector<8x8x8xf32> to vector<8x1x8x8xf32>
    tpu.vector_store %arg6[%c0_14, %c0_15, %c0_16, %c0_17], %34 {strides = array<i32>} : memref<8x4x8x8xf32, #tpu.memory_space<vmem>>, vector<8x1x8x8xf32>,
    %35 = vector.extract_strided_slice %29 {offsets = [0, 32], sizes = [64, 8], strides = [1, 1]} : vector<64x96xf32> to vector<64x8xf32>
    %36 = vector.shape_cast %35 : vector<64x8xf32> to vector<8x8x8xf32>
    %c0_18 = arith.constant 0 : index
    %c0_19 = arith.constant 0 : index
    %c0_20 = arith.constant 0 : index
    %c0_21 = arith.constant 0 : index
    %37 = vector.load %arg7[%c0_18, %c0_19, %c0_20, %c0_21] : memref<8x4x8x8xf32, #tpu.memory_space<vmem>>, vector<8x1x8x8xf32>
    %38 = vector.shape_cast %37 : vector<8x1x8x8xf32> to vector<8x8x8xf32>
    %39 = vector.shape_cast %36 : vector<8x8x8xf32> to vector<8x1x8x8xf32>
    tpu.vector_store %arg7[%c0_18, %c0_19, %c0_20, %c0_21], %39 {strides = array<i32>} : memref<8x4x8x8xf32, #tpu.memory_space<vmem>>, vector<8x1x8x8xf32>,
    %40 = vector.extract_strided_slice %29 {offsets = [0, 64], sizes = [64, 8], strides = [1, 1]} : vector<64x96xf32> to vector<64x8xf32>
    %41 = vector.shape_cast %40 : vector<64x8xf32> to vector<8x8x8xf32>
    %c0_22 = arith.constant 0 : index
    %c0_23 = arith.constant 0 : index
    %c0_24 = arith.constant 0 : index
    %c0_25 = arith.constant 0 : index
    %42 = vector.load %arg8[%c0_22, %c0_23, %c0_24, %c0_25] : memref<8x4x8x8xf32, #tpu.memory_space<vmem>>, vector<8x1x8x8xf32>
    %43 = vector.shape_cast %42 : vector<8x1x8x8xf32> to vector<8x8x8xf32>
    %44 = vector.shape_cast %41 : vector<8x8x8xf32> to vector<8x1x8x8xf32>
    tpu.vector_store %arg8[%c0_22, %c0_23, %c0_24, %c0_25], %44 {strides = array<i32>} : memref<8x4x8x8xf32, #tpu.memory_space<vmem>>, vector<8x1x8x8xf32>,
    %45 = vector.extract_strided_slice %29 {offsets = [0, 8], sizes = [64, 8], strides = [1, 1]} : vector<64x96xf32> to vector<64x8xf32>
    %46 = vector.shape_cast %45 : vector<64x8xf32> to vector<8x8x8xf32>
    %c0_26 = arith.constant 0 : index
    %c1 = arith.constant 1 : index
    %c0_27 = arith.constant 0 : index
    %c0_28 = arith.constant 0 : index
    %47 = vector.load %arg6[%c0_26, %c1, %c0_27, %c0_28] : memref<8x4x8x8xf32, #tpu.memory_space<vmem>>, vector<8x1x8x8xf32>
    %48 = vector.shape_cast %47 : vector<8x1x8x8xf32> to vector<8x8x8xf32>
    %49 = vector.shape_cast %46 : vector<8x8x8xf32> to vector<8x1x8x8xf32>
    tpu.vector_store %arg6[%c0_26, %c1, %c0_27, %c0_28], %49 {strides = array<i32>} : memref<8x4x8x8xf32, #tpu.memory_space<vmem>>, vector<8x1x8x8xf32>,
    %50 = vector.extract_strided_slice %29 {offsets = [0, 40], sizes = [64, 8], strides = [1, 1]} : vector<64x96xf32> to vector<64x8xf32>
    %51 = vector.shape_cast %50 : vector<64x8xf32> to vector<8x8x8xf32>
    %c0_29 = arith.constant 0 : index
    %c1_30 = arith.constant 1 : index
    %c0_31 = arith.constant 0 : index
    %c0_32 = arith.constant 0 : index
    %52 = vector.load %arg7[%c0_29, %c1_30, %c0_31, %c0_32] : memref<8x4x8x8xf32, #tpu.memory_space<vmem>>, vector<8x1x8x8xf32>
    %53 = vector.shape_cast %52 : vector<8x1x8x8xf32> to vector<8x8x8xf32>
    %54 = vector.shape_cast %51 : vector<8x8x8xf32> to vector<8x1x8x8xf32>
    tpu.vector_store %arg7[%c0_29, %c1_30, %c0_31, %c0_32], %54 {strides = array<i32>} : memref<8x4x8x8xf32, #tpu.memory_space<vmem>>, vector<8x1x8x8xf32>,
    %55 = vector.extract_strided_slice %29 {offsets = [0, 72], sizes = [64, 8], strides = [1, 1]} : vector<64x96xf32> to vector<64x8xf32>
    %56 = vector.shape_cast %55 : vector<64x8xf32> to vector<8x8x8xf32>
    %c0_33 = arith.constant 0 : index
    %c1_34 = arith.constant 1 : index
    %c0_35 = arith.constant 0 : index
    %c0_36 = arith.constant 0 : index
    %57 = vector.load %arg8[%c0_33, %c1_34, %c0_35, %c0_36] : memref<8x4x8x8xf32, #tpu.memory_space<vmem>>, vector<8x1x8x8xf32>
    %58 = vector.shape_cast %57 : vector<8x1x8x8xf32> to vector<8x8x8xf32>
    %59 = vector.shape_cast %56 : vector<8x8x8xf32> to vector<8x1x8x8xf32>
    tpu.vector_store %arg8[%c0_33, %c1_34, %c0_35, %c0_36], %59 {strides = array<i32>} : memref<8x4x8x8xf32, #tpu.memory_space<vmem>>, vector<8x1x8x8xf32>,
    %60 = vector.extract_strided_slice %29 {offsets = [0, 16], sizes = [64, 8], strides = [1, 1]} : vector<64x96xf32> to vector<64x8xf32>
    %61 = vector.shape_cast %60 : vector<64x8xf32> to vector<8x8x8xf32>
    %c0_37 = arith.constant 0 : index
    %c2 = arith.constant 2 : index
    %c0_38 = arith.constant 0 : index
    %c0_39 = arith.constant 0 : index
    %62 = vector.load %arg6[%c0_37, %c2, %c0_38, %c0_39] : memref<8x4x8x8xf32, #tpu.memory_space<vmem>>, vector<8x1x8x8xf32>
    %63 = vector.shape_cast %62 : vector<8x1x8x8xf32> to vector<8x8x8xf32>
    %64 = vector.shape_cast %61 : vector<8x8x8xf32> to vector<8x1x8x8xf32>
    tpu.vector_store %arg6[%c0_37, %c2, %c0_38, %c0_39], %64 {strides = array<i32>} : memref<8x4x8x8xf32, #tpu.memory_space<vmem>>, vector<8x1x8x8xf32>,
    %65 = vector.extract_strided_slice %29 {offsets = [0, 48], sizes = [64, 8], strides = [1, 1]} : vector<64x96xf32> to vector<64x8xf32>
    %66 = vector.shape_cast %65 : vector<64x8xf32> to vector<8x8x8xf32>
    %c0_40 = arith.constant 0 : index
    %c2_41 = arith.constant 2 : index
    %c0_42 = arith.constant 0 : index
    %c0_43 = arith.constant 0 : index
    %67 = vector.load %arg7[%c0_40, %c2_41, %c0_42, %c0_43] : memref<8x4x8x8xf32, #tpu.memory_space<vmem>>, vector<8x1x8x8xf32>
    %68 = vector.shape_cast %67 : vector<8x1x8x8xf32> to vector<8x8x8xf32>
    %69 = vector.shape_cast %66 : vector<8x8x8xf32> to vector<8x1x8x8xf32>
    tpu.vector_store %arg7[%c0_40, %c2_41, %c0_42, %c0_43], %69 {strides = array<i32>} : memref<8x4x8x8xf32, #tpu.memory_space<vmem>>, vector<8x1x8x8xf32>,
    %70 = vector.extract_strided_slice %29 {offsets = [0, 80], sizes = [64, 8], strides = [1, 1]} : vector<64x96xf32> to vector<64x8xf32>
    %71 = vector.shape_cast %70 : vector<64x8xf32> to vector<8x8x8xf32>
    %c0_44 = arith.constant 0 : index
    %c2_45 = arith.constant 2 : index
    %c0_46 = arith.constant 0 : index
    %c0_47 = arith.constant 0 : index
    %72 = vector.load %arg8[%c0_44, %c2_45, %c0_46, %c0_47] : memref<8x4x8x8xf32, #tpu.memory_space<vmem>>, vector<8x1x8x8xf32>
    %73 = vector.shape_cast %72 : vector<8x1x8x8xf32> to vector<8x8x8xf32>
    %74 = vector.shape_cast %71 : vector<8x8x8xf32> to vector<8x1x8x8xf32>
    tpu.vector_store %arg8[%c0_44, %c2_45, %c0_46, %c0_47], %74 {strides = array<i32>} : memref<8x4x8x8xf32, #tpu.memory_space<vmem>>, vector<8x1x8x8xf32>,
    %75 = vector.extract_strided_slice %29 {offsets = [0, 24], sizes = [64, 8], strides = [1, 1]} : vector<64x96xf32> to vector<64x8xf32>
    %76 = vector.shape_cast %75 : vector<64x8xf32> to vector<8x8x8xf32>
    %c0_48 = arith.constant 0 : index
    %c3 = arith.constant 3 : index
    %c0_49 = arith.constant 0 : index
    %c0_50 = arith.constant 0 : index
    %77 = vector.load %arg6[%c0_48, %c3, %c0_49, %c0_50] : memref<8x4x8x8xf32, #tpu.memory_space<vmem>>, vector<8x1x8x8xf32>
    %78 = vector.shape_cast %77 : vector<8x1x8x8xf32> to vector<8x8x8xf32>
    %79 = vector.shape_cast %76 : vector<8x8x8xf32> to vector<8x1x8x8xf32>
    tpu.vector_store %arg6[%c0_48, %c3, %c0_49, %c0_50], %79 {strides = array<i32>} : memref<8x4x8x8xf32, #tpu.memory_space<vmem>>, vector<8x1x8x8xf32>,
    %80 = vector.extract_strided_slice %29 {offsets = [0, 56], sizes = [64, 8], strides = [1, 1]} : vector<64x96xf32> to vector<64x8xf32>
    %81 = vector.shape_cast %80 : vector<64x8xf32> to vector<8x8x8xf32>
    %c0_51 = arith.constant 0 : index
    %c3_52 = arith.constant 3 : index
    %c0_53 = arith.constant 0 : index
    %c0_54 = arith.constant 0 : index
    %82 = vector.load %arg7[%c0_51, %c3_52, %c0_53, %c0_54] : memref<8x4x8x8xf32, #tpu.memory_space<vmem>>, vector<8x1x8x8xf32>
    %83 = vector.shape_cast %82 : vector<8x1x8x8xf32> to vector<8x8x8xf32>
    %84 = vector.shape_cast %81 : vector<8x8x8xf32> to vector<8x1x8x8xf32>
    tpu.vector_store %arg7[%c0_51, %c3_52, %c0_53, %c0_54], %84 {strides = array<i32>} : memref<8x4x8x8xf32, #tpu.memory_space<vmem>>, vector<8x1x8x8xf32>,
    %85 = vector.extract_strided_slice %29 {offsets = [0, 88], sizes = [64, 8], strides = [1, 1]} : vector<64x96xf32> to vector<64x8xf32>
    %86 = vector.shape_cast %85 : vector<64x8xf32> to vector<8x8x8xf32>
    %c0_55 = arith.constant 0 : index
    %c3_56 = arith.constant 3 : index
    %c0_57 = arith.constant 0 : index
    %c0_58 = arith.constant 0 : index
    %87 = vector.load %arg8[%c0_55, %c3_56, %c0_57, %c0_58] : memref<8x4x8x8xf32, #tpu.memory_space<vmem>>, vector<8x1x8x8xf32>
    %88 = vector.shape_cast %87 : vector<8x1x8x8xf32> to vector<8x8x8xf32>
    %89 = vector.shape_cast %86 : vector<8x8x8xf32> to vector<8x1x8x8xf32>
    tpu.vector_store %arg8[%c0_55, %c3_56, %c0_57, %c0_58], %89 {strides = array<i32>} : memref<8x4x8x8xf32, #tpu.memory_space<vmem>>, vector<8x1x8x8xf32>,
    return
  }
  func.func @transform_0(%arg0: i32) -> (i32, i32) {
    %c0_i32 = arith.constant 0 : i32
    %c0_i32_0 = arith.constant 0 : i32
    return %arg0, %c0_i32 : i32, i32
  }
  func.func @transform_1(%arg0: i32) -> (i32, i32) {
    %c0_i32 = arith.constant 0 : i32
    %c0_i32_0 = arith.constant 0 : i32
    %c0_i32_1 = arith.constant 0 : i32
    return %c0_i32, %c0_i32_0 : i32, i32
  }
  func.func @transform_2(%arg0: i32) -> (i32, i32) {
    %c0_i32 = arith.constant 0 : i32
    %c0_i32_0 = arith.constant 0 : i32
    %c0_i32_1 = arith.constant 0 : i32
    return %c0_i32, %c0_i32_0 : i32, i32
  }
  func.func @transform_3(%arg0: i32) -> (i32, i32) {
    %c0_i32 = arith.constant 0 : i32
    %c0_i32_0 = arith.constant 0 : i32
    %c0_i32_1 = arith.constant 0 : i32
    return %c0_i32, %c0_i32_0 : i32, i32
  }
  func.func @transform_4(%arg0: i32) -> (i32, i32) {
    %c0_i32 = arith.constant 0 : i32
    %c0_i32_0 = arith.constant 0 : i32
    %c0_i32_1 = arith.constant 0 : i32
    return %c0_i32, %c0_i32_0 : i32, i32
  }
  func.func @transform_5(%arg0: i32) -> (i32, i32, i32, i32) {
    %c0_i32 = arith.constant 0 : i32
    %c0_i32_0 = arith.constant 0 : i32
    %c0_i32_1 = arith.constant 0 : i32
    %c0_i32_2 = arith.constant 0 : i32
    return %arg0, %c0_i32, %c0_i32_0, %c0_i32_1 : i32, i32, i32, i32
  }
  func.func @transform_6(%arg0: i32) -> (i32, i32, i32, i32) {
    %c0_i32 = arith.constant 0 : i32
    %c0_i32_0 = arith.constant 0 : i32
    %c0_i32_1 = arith.constant 0 : i32
    %c0_i32_2 = arith.constant 0 : i32
    return %arg0, %c0_i32, %c0_i32_0, %c0_i32_1 : i32, i32, i32, i32
  }
  func.func @transform_7(%arg0: i32) -> (i32, i32, i32, i32) {
    %c0_i32 = arith.constant 0 : i32
    %c0_i32_0 = arith.constant 0 : i32
    %c0_i32_1 = arith.constant 0 : i32
    %c0_i32_2 = arith.constant 0 : i32
    return %arg0, %c0_i32, %c0_i32_0, %c0_i32_1 : i32, i32, i32, i32
  }
}

</mosaic_0001>

<bundles_post_ra>
// kernel: tpu_custom_call.1
= control target key start
LH: loop header
LB: loop body
LE: loop exit
PB: predicated region body
PF: predicated region fallthrough
CT: control target
= control target key end

     0   :  { %13 = vsyncpa [#allocation3], 0  ;;  %vm33_vm0 = vcmask 261120   ;;  %s1397_s0 = inlined_call_operand.vmem [shape: f32[64,32], index: 0, kind: input, shape index: {}]   ;;  %s1398_s1 = inlined_call_operand.vmem [shape: f32[1,32], index: 1, kind: input, shape index: {}]   ;;  %s1399_s2 = inlined_call_operand.vmem [shape: f32[1,32], index: 2, kind: input, shape index: {}]   ;;  %s1400_s3 = inlined_call_operand.vmem [shape: f32[32,96], index: 3, kind: input, shape index: {}]   ;;  %s1401_s4 = inlined_call_operand.vmem [shape: f32[1,96], index: 4, kind: input, shape index: {}]   ;;  %s1402_s5 = inlined_call_operand.hbm [shape: f32[8,4,8,8], index: 5, kind: output, shape index: {0}]   ;;  %s1403_s6 = inlined_call_operand.hbm [shape: f32[8,4,8,8], index: 6, kind: output, shape index: {1}]   ;;  %s1404_s7 = inlined_call_operand.hbm [shape: f32[8,4,8,8], index: 7, kind: output, shape index: {2}]  }
   0x1   :  { %v25_v0 = vld [vmem:[%s1397_s0] sm:$0xff]  ;;  %v26_v1 = vld [vmem:[%s1397_s0 + $0x8] sm:$0xff] }
   0x2   :  { %v29_v2 = vld [vmem:[%s1397_s0 + $0x20] sm:$0xff]  ;;  %v34_v3 = vsel %vm33_vm0, %v25_v0, 0.0  ;;  %v37_v4 = vsel %vm33_vm0, %v26_v1, 0.0  ;;  %v30_v5 = vld [vmem:[%s1397_s0 + $0x28] sm:$0xff] }
   0x3   :  { %35 = vadd.xlane.f32.xlu0 %v34_v3  ;;  %38 = vadd.xlane.f32.xlu1 %v37_v4  ;;  %v46_v6 = vsel %vm33_vm0, %v29_v2, 0.0  ;;  %v49_v7 = vsel %vm33_vm0, %v30_v5, 0.0 }
   0x4   :  { %14 = vsyncpa [#allocation5], 0  ;;  %v27_v8 = vld [vmem:[%s1397_s0 + $0x10] sm:$0xff]  ;;  %v28_v12 = vld [vmem:[%s1397_s0 + $0x18] sm:$0xff]  ;;  %vm309_vm1 = vcmask 64512   ;;  %s891_s27 = smov 96  }
   0x5   :  { %v31_v9 = vld [vmem:[%s1397_s0 + $0x30] sm:$0xff]  ;;  %v40_v10 = vsel %vm33_vm0, %v27_v8, 0.0  ;;  %v32_v13 = vld [vmem:[%s1397_s0 + $0x38] sm:$0xff]  ;;  %v43_v14 = vsel %vm33_vm0, %v28_v12, 0.0  ;;  %v169_v56 = vld [vmem:[%s1400_s3] sm:$0xff]  ;;  %s893_s28 = smov 120  }
   0x6   :  { %v52_v11 = vsel %vm33_vm0, %v31_v9, 0.0  ;;  %v55_v15 = vsel %vm33_vm0, %v32_v13, 0.0  ;;  %v170_v57 = vld [vmem:[%s1400_s3 + $0x8] sm:$0xff]  ;;  %v171_v59 = vld [vmem:[%s1400_s3 + $0x10] sm:$0xff]  ;;  %v172_v60 = vld [vmem:[%s1400_s3 + $0x18] sm:$0xff]  ;;  %s894_s29 = smov 88  }
   0x7   :  { %47 = vadd.xlane.f32.xlu0 %v46_v6  ;;  %50 = vadd.xlane.f32.xlu1 %v49_v7  ;;  %v777_v58 = vpack.c.bf16 %v170_v57, %v169_v56  ;;  %v781_v61 = vpack.c.bf16 %v172_v60, %v171_v59  ;;  %s895_s30 = smov 56   ;;  %s896_s8 = smov 112  }
   0x8   :  { %s897_s9 = smov 80   ;;  %s898_s10 = smov 48  }
   0x9   :  { %778 = vmatprep.subr.bf16.mxu0 %v777_v58  ;;  %785 = vmatprep.subr.bf16.mxu1 %v777_v58  ;;  %s899_s11 = smov 72   ;;  %s900_s12 = smov 104  }
   0xa   :  { %780 = vmatpush3.bf16.msra.mxu0 %v777_v58  ;;  %787 = vmatpush3.bf16.msra.mxu1 %v777_v58  ;;  %s901_s13 = smov 40   ;;  %s902_s14 = smov [#allocation2]  }
   0xb   :  { %41 = vadd.xlane.f32.xlu0 %v40_v10  ;;  %53 = vadd.xlane.f32.xlu1 %v52_v11  ;;  %s692_s15 = sshll.u32 %s902_s14, 4  ;;  %s693_s15 = int_to_ptr.vmem [resolvable:$true] %s692_s15 }
   0xc   :  { %782 = vmatprep.subr.bf16.mxu0 %v781_v61  ;;  %786 = vmatprep.subr.bf16.mxu1 %v781_v61  ;;  %s821_s16 = scalar_lea.vmem %s693_s15, 4096  ;;  %p826_p1 = scmp.lt.s32.totalorder %s693_s15, %s693_s15 }
   0xd   :  { %p822_p0 = scmp.ne.s32.totalorder %s693_s15, %s821_s16  ;;  %p827_p2 = scmp.lt.s32.totalorder %s821_s16, %s821_s16 }
   0xe   :  { %784 = vmatpush3.bf16.msra.mxu0 %v781_v61  ;;  %788 = vmatpush3.bf16.msra.mxu1 %v781_v61 }
   0xf   :  { %44 = vadd.xlane.f32.xlu0 %v43_v14  ;;  %56 = vadd.xlane.f32.xlu1 %v55_v15  ;;  %p828_p3 = por %p827_p2, %p826_p1 }
  0x11   :  { %p829_p4 = pnand %p828_p3, %p822_p0 }
  0x90   :  { %v36_v16 = vpop.xlane.xlu0 %35  ;;  %v39_v17 = vpop.xlane.xlu1 %38 }
  0x91   :  { %v59_v18 = vmul.f32 0.03125, %v36_v16  ;;  %v60_v19 = vmul.f32 0.03125, %v39_v17 }
  0x93   :  { %v979_v20 = vsub.f32 %v25_v0, %v59_v18  ;;  %v981_v21 = vsub.f32 %v26_v1, %v60_v19 }
  0x94   :  { %v48_v22 = vpop.xlane.xlu0 %47  ;;  %v51_v23 = vpop.xlane.xlu1 %50 }
  0x95   :  { %v63_v24 = vmul.f32 0.03125, %v48_v22  ;;  %v64_v25 = vmul.f32 0.03125, %v51_v23  ;;  %v75_v26 = vmul.f32 %v979_v20, %v979_v20  ;;  %v76_v27 = vmul.f32 %v981_v21, %v981_v21  ;;  %v734_v22 = vld [vmem:[%s1398_s1] ss:$0 sm:$0xff] }
  0x97   :  { %v987_v28 = vsub.f32 %v29_v2, %v63_v24  ;;  %v989_v29 = vsub.f32 %v30_v5, %v64_v25  ;;  %v83_v30 = vsel %vm33_vm0, %v75_v26, 0.0  ;;  %v86_v33 = vsel %vm33_vm0, %v76_v27, 0.0  ;;  %v735_v26 = vld [vmem:[%s1399_s2] ss:$0 sm:$0xff] }
  0x98   :  { %84 = vadd.xlane.f32.xlu0 %v83_v30  ;;  %v42_v31 = vpop.xlane.xlu0 %41  ;;  %v54_v32 = vpop.xlane.xlu1 %53 }
  0x99   :  { %v61_v34 = vmul.f32 0.03125, %v42_v31  ;;  %v65_v35 = vmul.f32 0.03125, %v54_v32  ;;  %v79_v36 = vmul.f32 %v987_v28, %v987_v28  ;;  %v80_v37 = vmul.f32 %v989_v29, %v989_v29 }
  0x9b   :  { %v997_v38 = vsub.f32 %v27_v8, %v61_v34  ;;  %v999_v39 = vsub.f32 %v31_v9, %v65_v35  ;;  %v95_v40 = vsel %vm33_vm0, %v79_v36, 0.0  ;;  %v98_v43 = vsel %vm33_vm0, %v80_v37, 0.0 }
  0x9c   :  { %87 = vadd.xlane.f32.xlu0 %v86_v33  ;;  %96 = vadd.xlane.f32.xlu1 %v95_v40  ;;  %v45_v41 = vpop.xlane.xlu0 %44  ;;  %v57_v42 = vpop.xlane.xlu1 %56 }
  0x9d   :  { %v62_v44 = vmul.f32 0.03125, %v45_v41  ;;  %v66_v45 = vmul.f32 0.03125, %v57_v42  ;;  %v77_v46 = vmul.f32 %v997_v38, %v997_v38  ;;  %v81_v47 = vmul.f32 %v999_v39, %v999_v39 }
  0x9f   :  { %v1007_v48 = vsub.f32 %v28_v12, %v62_v44  ;;  %v1009_v49 = vsub.f32 %v32_v13, %v66_v45  ;;  %v89_v50 = vsel %vm33_vm0, %v77_v46, 0.0  ;;  %v101_v51 = vsel %vm33_vm0, %v81_v47, 0.0 }
  0xa0   :  { %99 = vadd.xlane.f32.xlu1 %v98_v43  ;;  %90 = vadd.xlane.f32.xlu0 %v89_v50 }
  0xa1   :  { %v78_v52 = vmul.f32 %v1007_v48, %v1007_v48  ;;  %v82_v53 = vmul.f32 %v1009_v49, %v1009_v49 }
  0xa3   :  { %v92_v54 = vsel %vm33_vm0, %v78_v52, 0.0  ;;  %v104_v55 = vsel %vm33_vm0, %v82_v53, 0.0 }
  0xa4   :  { %102 = vadd.xlane.f32.xlu1 %v101_v51  ;;  %93 = vadd.xlane.f32.xlu0 %v92_v54 }
  0xa8   :  { %105 = vadd.xlane.f32.xlu1 %v104_v55 }
 0x125   :  { %v85_v62 = vpop.xlane.xlu0 %84 }
 0x126   :  { %v107_v63 = vmul.f32 0.03125, %v85_v62 }
 0x128   :  { %v115_v0 = vadd.f32 1e-05, %v107_v63 }
 0x129   :  { %v97_v1 = vpop.xlane.xlu1 %96  ;;  %v88_v2 = vpop.xlane.xlu0 %87 }
 0x12a   :  { %805 = vrsqrt.f32 %v115_v0  ;;  %v111_v3 = vmul.f32 0.03125, %v97_v1  ;;  %v108_v4 = vmul.f32 0.03125, %v88_v2 }
 0x12c   :  { %v119_v5 = vadd.f32 1e-05, %v111_v3  ;;  %v116_v6 = vadd.f32 1e-05, %v108_v4 }
 0x12d   :  { %v100_v7 = vpop.xlane.xlu1 %99  ;;  %v91_v8 = vpop.xlane.xlu0 %90 }
 0x12e   :  { %807 = vrsqrt.f32 %v119_v5  ;;  %v112_v9 = vmul.f32 0.03125, %v100_v7  ;;  %v109_v10 = vmul.f32 0.03125, %v91_v8 }
 0x12f   :  { %809 = vrsqrt.f32 %v116_v6 }
 0x130   :  { %v120_v11 = vadd.f32 1e-05, %v112_v9  ;;  %v117_v12 = vadd.f32 1e-05, %v109_v10 }
 0x131   :  { %v103_v13 = vpop.xlane.xlu1 %102  ;;  %v94_v14 = vpop.xlane.xlu0 %93 }
 0x132   :  { %811 = vrsqrt.f32 %v120_v11  ;;  %v113_v15 = vmul.f32 0.03125, %v103_v13  ;;  %v110_v16 = vmul.f32 0.03125, %v94_v14 }
 0x133   :  { %813 = vrsqrt.f32 %v117_v12 }
 0x134   :  { %v806_v17 = vpop.eup %805  ;;  %v121_v18 = vadd.f32 1e-05, %v113_v15  ;;  %v118_v19 = vadd.f32 1e-05, %v110_v16 }
 0x135   :  { %v106_v23 = vpop.xlane.xlu1 %105  ;;  %v131_v24 = vmul.f32 %v806_v17, %v979_v20 }
 0x136   :  { %815 = vrsqrt.f32 %v121_v18  ;;  %v114_v25 = vmul.f32 0.03125, %v106_v23 }
 0x137   :  { %817 = vrsqrt.f32 %v118_v19  ;;  %v146_v27 = vmul.f32 %v734_v22, %v131_v24 }
 0x138   :  { %v808_v30 = vpop.eup %807  ;;  %v122_v31 = vadd.f32 1e-05, %v114_v25 }
 0x139   :  { %v810_v32 = vpop.eup %809  ;;  %v161_v33 = vadd.f32 %v735_v26, %v146_v27  ;;  %v135_v34 = vmul.f32 %v808_v30, %v987_v28 }
 0x13a   :  { %819 = vrsqrt.f32 %v122_v31  ;;  %v132_v35 = vmul.f32 %v810_v32, %v981_v21 }
 0x13b   :  { %765 = vmatprep.mubr.msk.f32.mxu0 %vm33_vm0, %v161_v33  ;;  %v150_v20 = vmul.f32 %v734_v22, %v135_v34 }
 0x13c   :  { %v812_v36 = vpop.eup %811  ;;  %v147_v37 = vmul.f32 %v734_v22, %v132_v35 }
 0x13d   :  { %v814_v40 = vpop.eup %813  ;;  %v165_v41 = vadd.f32 %v735_v26, %v150_v20  ;;  %v136_v42 = vmul.f32 %v812_v36, %v989_v29 }
 0x13e   :  { %v162_v43 = vadd.f32 %v735_v26, %v147_v37  ;;  %v133_v44 = vmul.f32 %v814_v40, %v997_v38 }
 0x13f   :  { %771 = vmatprep.mubr.msk.f32.mxu1 %vm33_vm0, %v165_v41  ;;  %v151_v45 = vmul.f32 %v734_v22, %v136_v42 }
 0x140   :  { %v816_v46 = vpop.eup %815  ;;  %766 = vmatmul.mubr.msk.f32.vlgmr.msra.gmra.mrb[0].mxu0 %vm33_vm0, %v162_v43  ;;  %v148_v28 = vmul.f32 %v734_v22, %v133_v44 }
 0x141   :  { %v818_v21 = vpop.eup %817  ;;  %v166_v47 = vadd.f32 %v735_v26, %v151_v45  ;;  %v137_v50 = vmul.f32 %v816_v46, %v999_v39 }
 0x142   :  { %v163_v51 = vadd.f32 %v735_v26, %v148_v28  ;;  %v134_v52 = vmul.f32 %v818_v21, %v1007_v48  ;;  %v736_v48 = vld [vmem:[%s1401_s4] ss:$0 sm:$0xff]  ;;  %s892_s4 = smov 64  }
 0x143   :  { %772 = vmatmul.mubr.msk.f32.vlgmr.msra.gmra.mrb[0].mxu1 %vm33_vm0, %v166_v47  ;;  %v152_v29 = vmul.f32 %v734_v22, %v137_v50 }
 0x144   :  { %v820_v53 = vpop.eup %819  ;;  %768 = vmatprep.mubr.msk.f32.mxu0 %vm33_vm0, %v163_v51  ;;  %v149_v38 = vmul.f32 %v734_v22, %v134_v52 }
 0x145   :  { %v167_v54 = vadd.f32 %v735_v26, %v152_v29  ;;  %v138_v55 = vmul.f32 %v820_v53, %v1009_v49 }
 0x146   :  { %v164_v56 = vadd.f32 %v735_v26, %v149_v38 }
 0x147   :  { %774 = vmatprep.mubr.msk.f32.mxu1 %vm33_vm0, %v167_v54  ;;  %v153_v57 = vmul.f32 %v734_v22, %v138_v55 }
 0x148   :  { %769 = vmatmul.mubr.msk.f32.gmra.mrb[2].mxu0 %vm33_vm0, %v164_v56 }
 0x149   :  { %v168_v39 = vadd.f32 %v735_v26, %v153_v57 }
 0x14b   :  { %775 = vmatmul.mubr.msk.f32.gmra.mrb[2].mxu1 %vm33_vm0, %v168_v39 }
 0x213   :  { %v767_v58 = vpop.f32.mrb[0].mxu0 }
 0x214   :  { %v1056_v59 = vadd.f32 %v767_v58, %v736_v48  ;;  %v270_v60 = vpop.f32.mrb[1].mxu0 }
 0x215   :  { %v1058_v61 = vadd.f32 %v736_v48, %v270_v60 }
 0x216   :  { %311 = vst.msk [vmem:[#allocation2 + $0x20] sm:$0xff] %vm309_vm1, %v1056_v59  ;;  %328 = vrot.lane.b32.xlu1 %v1056_v59, %s891_s27  ;;  %v773_v49 = vpop.f32.mrb[0].mxu1 }
 0x217   :  { %310 = vst.msk [vmem:[#allocation2] sm:$0xff] %vm309_vm1, %v1058_v61  ;;  %v1066_v62 = vadd.f32 %v773_v49, %v736_v48  ;;  %326 = vrot.lane.b32.xlu0 %v1058_v61, %s891_s27  ;;  %v290_v63 = vpop.f32.mrb[1].mxu1 }
 0x218   :  { %v1070_v0 = vadd.f32 %v736_v48, %v290_v63 }
 0x219   :  { %315 = vst.msk [vmem:[#allocation2 + $0xa0] sm:$0xff] %vm309_vm1, %v1066_v62 }
 0x21a   :  { %314 = vst.msk [vmem:[#allocation2 + $0x80] sm:$0xff] %vm309_vm1, %v1070_v0  ;;  %336 = vrot.lane.b32.xlu1 %v1066_v62, %s891_s27 }
 0x21b   :  { %334 = vrot.lane.b32.xlu0 %v1070_v0, %s891_s27  ;;  %v770_v1 = vpop.f32.mrb[2].mxu0 }
 0x21c   :  { %v1080_v2 = vadd.f32 %v770_v1, %v736_v48  ;;  %v280_v3 = vpop.f32.mrb[3].mxu0 }
 0x21d   :  { %v1082_v4 = vadd.f32 %v736_v48, %v280_v3 }
 0x21e   :  { %313 = vst.msk [vmem:[#allocation2 + $0x60] sm:$0xff] %vm309_vm1, %v1080_v2  ;;  %360 = vrot.lane.b32.xlu1 %v1056_v59, %s892_s4  ;;  %v776_v5 = vpop.f32.mrb[2].mxu1 }
 0x21f   :  { %312 = vst.msk [vmem:[#allocation2 + $0x40] sm:$0xff] %vm309_vm1, %v1082_v4  ;;  %v1090_v6 = vadd.f32 %v776_v5, %v736_v48  ;;  %358 = vrot.lane.b32.xlu0 %v1058_v61, %s892_s4  ;;  %v300_v7 = vpop.f32.mrb[3].mxu1 }
 0x220   :  { %v1094_v8 = vadd.f32 %v736_v48, %v300_v7 }
 0x221   :  { %317 = vst.msk [vmem:[#allocation2 + $0xe0] sm:$0xff] %vm309_vm1, %v1090_v6 }
 0x222   :  { %316 = vst.msk [vmem:[#allocation2 + $0xc0] sm:$0xff] %vm309_vm1, %v1094_v8  ;;  %368 = vrot.lane.b32.xlu1 %v1066_v62, %s892_s4 }
 0x223   :  { %366 = vrot.lane.b32.xlu0 %v1070_v0, %s892_s4 }
 0x226   :  { %392 = vrot.lane.b32.xlu1 %v1056_v59, %s893_s28 }
 0x227   :  { %390 = vrot.lane.b32.xlu0 %v1058_v61, %s893_s28 }
 0x22a   :  { %400 = vrot.lane.b32.xlu1 %v1066_v62, %s893_s28 }
 0x22b   :  { %398 = vrot.lane.b32.xlu0 %v1070_v0, %s893_s28 }
 0x22e   :  { %425 = vrot.lane.b32.xlu1 %v1056_v59, %s894_s29 }
 0x22f   :  { %423 = vrot.lane.b32.xlu0 %v1058_v61, %s894_s29 }
 0x232   :  { %433 = vrot.lane.b32.xlu1 %v1066_v62, %s894_s29 }
 0x233   :  { %431 = vrot.lane.b32.xlu0 %v1070_v0, %s894_s29 }
 0x236   :  { %458 = vrot.lane.b32.xlu1 %v1056_v59, %s895_s30 }
 0x237   :  { %456 = vrot.lane.b32.xlu0 %v1058_v61, %s895_s30 }
 0x23a   :  { %466 = vrot.lane.b32.xlu1 %v1066_v62, %s895_s30 }
 0x23b   :  { %464 = vrot.lane.b32.xlu0 %v1070_v0, %s895_s30 }
 0x23e   :  { %491 = vrot.lane.b32.xlu1 %v1056_v59, %s896_s8 }
 0x23f   :  { %489 = vrot.lane.b32.xlu0 %v1058_v61, %s896_s8 }
 0x242   :  { %499 = vrot.lane.b32.xlu1 %v1066_v62, %s896_s8 }
 0x243   :  { %497 = vrot.lane.b32.xlu0 %v1070_v0, %s896_s8 }
 0x246   :  { %524 = vrot.lane.b32.xlu1 %v1056_v59, %s897_s9 }
 0x247   :  { %522 = vrot.lane.b32.xlu0 %v1058_v61, %s897_s9 }
 0x24a   :  { %532 = vrot.lane.b32.xlu1 %v1066_v62, %s897_s9 }
 0x24b   :  { %530 = vrot.lane.b32.xlu0 %v1070_v0, %s897_s9 }
 0x24e   :  { %557 = vrot.lane.b32.xlu1 %v1056_v59, %s898_s10 }
 0x24f   :  { %555 = vrot.lane.b32.xlu0 %v1058_v61, %s898_s10 }
 0x252   :  { %623 = vrot.lane.b32.xlu1 %v1056_v59, %s899_s11 }
 0x253   :  { %621 = vrot.lane.b32.xlu0 %v1058_v61, %s899_s11 }
 0x256   :  { %631 = vrot.lane.b32.xlu1 %v1066_v62, %s899_s11 }
 0x257   :  { %629 = vrot.lane.b32.xlu0 %v1070_v0, %s899_s11 }
 0x25a   :  { %565 = vrot.lane.b32.xlu1 %v1066_v62, %s898_s10 }
 0x25b   :  { %563 = vrot.lane.b32.xlu0 %v1070_v0, %s898_s10 }
 0x25e   :  { %590 = vrot.lane.b32.xlu1 %v1056_v59, %s900_s12 }
 0x25f   :  { %588 = vrot.lane.b32.xlu0 %v1058_v61, %s900_s12 }
 0x262   :  { %598 = vrot.lane.b32.xlu1 %v1066_v62, %s900_s12 }
 0x263   :  { %596 = vrot.lane.b32.xlu0 %v1070_v0, %s900_s12 }
 0x266   :  { %656 = vrot.lane.b32.xlu1 %v1056_v59, %s901_s13 }
 0x267   :  { %654 = vrot.lane.b32.xlu0 %v1058_v61, %s901_s13 }
 0x26a   :  { %664 = vrot.lane.b32.xlu1 %v1066_v62, %s901_s13 }
 0x26b   :  { %662 = vrot.lane.b32.xlu0 %v1070_v0, %s901_s13 }
 0x26e   :  { %332 = vrot.lane.b32.xlu1 %v1080_v2, %s891_s27 }
 0x26f   :  { %338 = vrot.lane.b32.xlu0 %v1094_v8, %s891_s27 }
 0x272   :  { %340 = vrot.lane.b32.xlu1 %v1090_v6, %s891_s27 }
 0x273   :  { %362 = vrot.lane.b32.xlu0 %v1082_v4, %s892_s4 }
 0x276   :  { %364 = vrot.lane.b32.xlu1 %v1080_v2, %s892_s4 }
 0x277   :  { %370 = vrot.lane.b32.xlu0 %v1094_v8, %s892_s4 }
 0x27a   :  { %372 = vrot.lane.b32.xlu1 %v1090_v6, %s892_s4 }
 0x27b   :  { %394 = vrot.lane.b32.xlu0 %v1082_v4, %s893_s28 }
 0x27e   :  { %396 = vrot.lane.b32.xlu1 %v1080_v2, %s893_s28 }
 0x27f   :  { %402 = vrot.lane.b32.xlu0 %v1094_v8, %s893_s28 }
 0x282   :  { %404 = vrot.lane.b32.xlu1 %v1090_v6, %s893_s28 }
 0x283   :  { %427 = vrot.lane.b32.xlu0 %v1082_v4, %s894_s29 }
 0x286   :  { %429 = vrot.lane.b32.xlu1 %v1080_v2, %s894_s29 }
 0x287   :  { %435 = vrot.lane.b32.xlu0 %v1094_v8, %s894_s29 }
 0x288   :  { %v329_v9 = vpop.permute.xlu1 %328 }
 0x289   :  { %351 = vst.msk [vmem:[#allocation4 + $0x20] sm:$0xff] %vm309_vm1, %v329_v9  ;;  %v327_v10 = vpop.permute.xlu0 %326 }
 0x28a   :  { %350 = vst.msk [vmem:[#allocation4] sm:$0xff] %vm309_vm1, %v327_v10  ;;  %437 = vrot.lane.b32.xlu1 %v1090_v6, %s894_s29 }
 0x28b   :  { %460 = vrot.lane.b32.xlu0 %v1082_v4, %s895_s30 }
 0x28c   :  { %v337_v11 = vpop.permute.xlu1 %336 }
 0x28d   :  { %355 = vst.msk [vmem:[#allocation4 + $0xa0] sm:$0xff] %vm309_vm1, %v337_v11  ;;  %v335_v12 = vpop.permute.xlu0 %334 }
 0x28e   :  { %354 = vst.msk [vmem:[#allocation4 + $0x80] sm:$0xff] %vm309_vm1, %v335_v12  ;;  %462 = vrot.lane.b32.xlu1 %v1080_v2, %s895_s30 }
 0x28f   :  { %468 = vrot.lane.b32.xlu0 %v1094_v8, %s895_s30 }
 0x290   :  { %v361_v13 = vpop.permute.xlu1 %360 }
 0x291   :  { %383 = vst.msk [vmem:[#allocation6 + $0x20] sm:$0xff] %vm309_vm1, %v361_v13  ;;  %v359_v14 = vpop.permute.xlu0 %358 }
 0x292   :  { %382 = vst.msk [vmem:[#allocation6] sm:$0xff] %vm309_vm1, %v359_v14  ;;  %470 = vrot.lane.b32.xlu1 %v1090_v6, %s895_s30 }
 0x293   :  { %493 = vrot.lane.b32.xlu0 %v1082_v4, %s896_s8 }
 0x294   :  { %v369_v15 = vpop.permute.xlu1 %368 }
 0x295   :  { %387 = vst.msk [vmem:[#allocation6 + $0xa0] sm:$0xff] %vm309_vm1, %v369_v15  ;;  %v367_v16 = vpop.permute.xlu0 %366 }
 0x296   :  { %386 = vst.msk [vmem:[#allocation6 + $0x80] sm:$0xff] %vm309_vm1, %v367_v16  ;;  %495 = vrot.lane.b32.xlu1 %v1080_v2, %s896_s8 }
 0x297   :  { %501 = vrot.lane.b32.xlu0 %v1094_v8, %s896_s8 }
 0x298   :  { %v393_v17 = vpop.permute.xlu1 %392 }
 0x299   :  { %416 = vst.msk [vmem:[#allocation2 + $0x28] sm:$0xff] %vm309_vm1, %v393_v17  ;;  %v391_v18 = vpop.permute.xlu0 %390 }
 0x29a   :  { %415 = vst.msk [vmem:[#allocation2 + $0x8] sm:$0xff] %vm309_vm1, %v391_v18  ;;  %503 = vrot.lane.b32.xlu1 %v1090_v6, %s896_s8 }
 0x29b   :  { %526 = vrot.lane.b32.xlu0 %v1082_v4, %s897_s9 }
 0x29c   :  { %v401_v19 = vpop.permute.xlu1 %400 }
 0x29d   :  { %420 = vst.msk [vmem:[#allocation2 + $0xa8] sm:$0xff] %vm309_vm1, %v401_v19  ;;  %v399_v22 = vpop.permute.xlu0 %398 }
 0x29e   :  { %419 = vst.msk [vmem:[#allocation2 + $0x88] sm:$0xff] %vm309_vm1, %v399_v22  ;;  %528 = vrot.lane.b32.xlu1 %v1080_v2, %s897_s9 }
 0x29f   :  { %534 = vrot.lane.b32.xlu0 %v1094_v8, %s897_s9 }
 0x2a0   :  { %v426_v23 = vpop.permute.xlu1 %425 }
 0x2a1   :  { %449 = vst.msk [vmem:[#allocation4 + $0x28] sm:$0xff] %vm309_vm1, %v426_v23  ;;  %v424_v24 = vpop.permute.xlu0 %423 }
 0x2a2   :  { %448 = vst.msk [vmem:[#allocation4 + $0x8] sm:$0xff] %vm309_vm1, %v424_v24  ;;  %536 = vrot.lane.b32.xlu1 %v1090_v6, %s897_s9 }
 0x2a3   :  { %625 = vrot.lane.b32.xlu0 %v1082_v4, %s899_s11 }
 0x2a4   :  { %v434_v25 = vpop.permute.xlu1 %433 }
 0x2a5   :  { %453 = vst.msk [vmem:[#allocation4 + $0xa8] sm:$0xff] %vm309_vm1, %v434_v25  ;;  %v432_v26 = vpop.permute.xlu0 %431 }
 0x2a6   :  { %452 = vst.msk [vmem:[#allocation4 + $0x88] sm:$0xff] %vm309_vm1, %v432_v26  ;;  %627 = vrot.lane.b32.xlu1 %v1080_v2, %s899_s11 }
 0x2a7   :  { %633 = vrot.lane.b32.xlu0 %v1094_v8, %s899_s11 }
 0x2a8   :  { %v459_v27 = vpop.permute.xlu1 %458 }
 0x2a9   :  { %482 = vst.msk [vmem:[#allocation6 + $0x28] sm:$0xff] %vm309_vm1, %v459_v27  ;;  %v457_v30 = vpop.permute.xlu0 %456 }
 0x2aa   :  { %481 = vst.msk [vmem:[#allocation6 + $0x8] sm:$0xff] %vm309_vm1, %v457_v30  ;;  %635 = vrot.lane.b32.xlu1 %v1090_v6, %s899_s11 }
 0x2ab   :  { %559 = vrot.lane.b32.xlu0 %v1082_v4, %s898_s10 }
 0x2ac   :  { %v467_v31 = vpop.permute.xlu1 %466 }
 0x2ad   :  { %486 = vst.msk [vmem:[#allocation6 + $0xa8] sm:$0xff] %vm309_vm1, %v467_v31  ;;  %v465_v32 = vpop.permute.xlu0 %464 }
 0x2ae   :  { %485 = vst.msk [vmem:[#allocation6 + $0x88] sm:$0xff] %vm309_vm1, %v465_v32  ;;  %561 = vrot.lane.b32.xlu1 %v1080_v2, %s898_s10 }
 0x2af   :  { %567 = vrot.lane.b32.xlu0 %v1094_v8, %s898_s10 }
 0x2b0   :  { %v492_v33 = vpop.permute.xlu1 %491 }
 0x2b1   :  { %515 = vst.msk [vmem:[#allocation2 + $0x30] sm:$0xff] %vm309_vm1, %v492_v33  ;;  %v490_v34 = vpop.permute.xlu0 %489 }
 0x2b2   :  { %514 = vst.msk [vmem:[#allocation2 + $0x10] sm:$0xff] %vm309_vm1, %v490_v34  ;;  %569 = vrot.lane.b32.xlu1 %v1090_v6, %s898_s10 }
 0x2b3   :  { %592 = vrot.lane.b32.xlu0 %v1082_v4, %s900_s12 }
 0x2b4   :  { %v500_v35 = vpop.permute.xlu1 %499 }
 0x2b5   :  { %519 = vst.msk [vmem:[#allocation2 + $0xb0] sm:$0xff] %vm309_vm1, %v500_v35  ;;  %v498_v20 = vpop.permute.xlu0 %497 }
 0x2b6   :  { %518 = vst.msk [vmem:[#allocation2 + $0x90] sm:$0xff] %vm309_vm1, %v498_v20  ;;  %594 = vrot.lane.b32.xlu1 %v1080_v2, %s900_s12 }
 0x2b7   :  { %600 = vrot.lane.b32.xlu0 %v1094_v8, %s900_s12 }
 0x2b8   :  { %v525_v36 = vpop.permute.xlu1 %524 }
 0x2b9   :  { %548 = vst.msk [vmem:[#allocation4 + $0x30] sm:$0xff] %vm309_vm1, %v525_v36  ;;  %v523_v37 = vpop.permute.xlu0 %522 }
 0x2ba   :  { %547 = vst.msk [vmem:[#allocation4 + $0x10] sm:$0xff] %vm309_vm1, %v523_v37  ;;  %602 = vrot.lane.b32.xlu1 %v1090_v6, %s900_s12 }
 0x2bb   :  { %658 = vrot.lane.b32.xlu0 %v1082_v4, %s901_s13 }
 0x2bc   :  { %v533_v40 = vpop.permute.xlu1 %532 }
 0x2bd   :  { %552 = vst.msk [vmem:[#allocation4 + $0xb0] sm:$0xff] %vm309_vm1, %v533_v40  ;;  %v531_v41 = vpop.permute.xlu0 %530 }
 0x2be   :  { %551 = vst.msk [vmem:[#allocation4 + $0x90] sm:$0xff] %vm309_vm1, %v531_v41  ;;  %660 = vrot.lane.b32.xlu1 %v1080_v2, %s901_s13 }
 0x2bf   :  { %666 = vrot.lane.b32.xlu0 %v1094_v8, %s901_s13 }
 0x2c0   :  { %v558_v42 = vpop.permute.xlu1 %557 }
 0x2c1   :  { %581 = vst.msk [vmem:[#allocation6 + $0x30] sm:$0xff] %vm309_vm1, %v558_v42  ;;  %v556_v43 = vpop.permute.xlu0 %555 }
 0x2c2   :  { %580 = vst.msk [vmem:[#allocation6 + $0x10] sm:$0xff] %vm309_vm1, %v556_v43  ;;  %330 = vrot.lane.b32.xlu1 %v1082_v4, %s891_s27 }
 0x2c4   :  { %v624_v44 = vpop.permute.xlu1 %623 }
 0x2c5   :  { %647 = vst.msk [vmem:[#allocation4 + $0x38] sm:$0xff] %vm309_vm1, %v624_v44  ;;  %v622_v45 = vpop.permute.xlu0 %621 }
 0x2c6   :  { %646 = vst.msk [vmem:[#allocation4 + $0x18] sm:$0xff] %vm309_vm1, %v622_v45  ;;  %668 = vrot.lane.b32.xlu1 %v1090_v6, %s901_s13 }
 0x2c8   :  { %v632_v46 = vpop.permute.xlu1 %631 }
 0x2c9   :  { %651 = vst.msk [vmem:[#allocation4 + $0xb8] sm:$0xff] %vm309_vm1, %v632_v46  ;;  %v630_v28 = vpop.permute.xlu0 %629 }
 0x2ca   :  { %650 = vst.msk [vmem:[#allocation4 + $0x98] sm:$0xff] %vm309_vm1, %v630_v28 }
 0x2cc   :  { %v566_v21 = vpop.permute.xlu1 %565 }
 0x2cd   :  { %585 = vst.msk [vmem:[#allocation6 + $0xb0] sm:$0xff] %vm309_vm1, %v566_v21  ;;  %v564_v47 = vpop.permute.xlu0 %563 }
 0x2ce   :  { %584 = vst.msk [vmem:[#allocation6 + $0x90] sm:$0xff] %vm309_vm1, %v564_v47 }
 0x2d0   :  { %v591_v50 = vpop.permute.xlu1 %590 }
 0x2d1   :  { %614 = vst.msk [vmem:[#allocation2 + $0x38] sm:$0xff] %vm309_vm1, %v591_v50  ;;  %v589_v51 = vpop.permute.xlu0 %588 }
 0x2d2   :  { %613 = vst.msk [vmem:[#allocation2 + $0x18] sm:$0xff] %vm309_vm1, %v589_v51 }
 0x2d4   :  { %v599_v52 = vpop.permute.xlu1 %598 }
 0x2d5   :  { %618 = vst.msk [vmem:[#allocation2 + $0xb8] sm:$0xff] %vm309_vm1, %v599_v52  ;;  %v597_v29 = vpop.permute.xlu0 %596 }
 0x2d6   :  { %617 = vst.msk [vmem:[#allocation2 + $0x98] sm:$0xff] %vm309_vm1, %v597_v29 }
 0x2d8   :  { %v657_v53 = vpop.permute.xlu1 %656 }
 0x2d9   :  { %680 = vst.msk [vmem:[#allocation6 + $0x38] sm:$0xff] %vm309_vm1, %v657_v53  ;;  %v655_v38 = vpop.permute.xlu0 %654 }
 0x2da   :  { %679 = vst.msk [vmem:[#allocation6 + $0x18] sm:$0xff] %vm309_vm1, %v655_v38 }
 0x2dc   :  { %v665_v54 = vpop.permute.xlu1 %664 }
 0x2dd   :  { %684 = vst.msk [vmem:[#allocation6 + $0xb8] sm:$0xff] %vm309_vm1, %v665_v54  ;;  %v663_v55 = vpop.permute.xlu0 %662 }
 0x2de   :  { %683 = vst.msk [vmem:[#allocation6 + $0x98] sm:$0xff] %vm309_vm1, %v663_v55 }
 0x2e0   :  { %v333_v56 = vpop.permute.xlu1 %332 }
 0x2e1   :  { %353 = vst.msk [vmem:[#allocation4 + $0x60] sm:$0xff] %vm309_vm1, %v333_v56  ;;  %v339_v57 = vpop.permute.xlu0 %338 }
 0x2e2   :  { %356 = vst.msk [vmem:[#allocation4 + $0xc0] sm:$0xff] %vm309_vm1, %v339_v57 }
 0x2e4   :  { %v341_v39 = vpop.permute.xlu1 %340 }
 0x2e5   :  { %357 = vst.msk [vmem:[#allocation4 + $0xe0] sm:$0xff] %vm309_vm1, %v341_v39  ;;  %v363_v48 = vpop.permute.xlu0 %362 }
 0x2e6   :  { %384 = vst.msk [vmem:[#allocation6 + $0x40] sm:$0xff] %vm309_vm1, %v363_v48 }
 0x2e8   :  { %v365_v58 = vpop.permute.xlu1 %364 }
 0x2e9   :  { %385 = vst.msk [vmem:[#allocation6 + $0x60] sm:$0xff] %vm309_vm1, %v365_v58  ;;  %v371_v59 = vpop.permute.xlu0 %370 }
 0x2ea   :  { %388 = vst.msk [vmem:[#allocation6 + $0xc0] sm:$0xff] %vm309_vm1, %v371_v59 }
 0x2ec   :  { %v373_v60 = vpop.permute.xlu1 %372 }
 0x2ed   :  { %389 = vst.msk [vmem:[#allocation6 + $0xe0] sm:$0xff] %vm309_vm1, %v373_v60  ;;  %v395_v61 = vpop.permute.xlu0 %394 }
 0x2ee   :  { %417 = vst.msk [vmem:[#allocation2 + $0x48] sm:$0xff] %vm309_vm1, %v395_v61 }
 0x2f0   :  { %v397_v49 = vpop.permute.xlu1 %396 }
 0x2f1   :  { %418 = vst.msk [vmem:[#allocation2 + $0x68] sm:$0xff] %vm309_vm1, %v397_v49  ;;  %v403_v62 = vpop.permute.xlu0 %402 }
 0x2f2   :  { %421 = vst.msk [vmem:[#allocation2 + $0xc8] sm:$0xff] %vm309_vm1, %v403_v62 }
 0x2f4   :  { %v405_v63 = vpop.permute.xlu1 %404 }
 0x2f5   :  { %422 = vst.msk [vmem:[#allocation2 + $0xe8] sm:$0xff] %vm309_vm1, %v405_v63  ;;  %v428_v0 = vpop.permute.xlu0 %427 }
 0x2f6   :  { %450 = vst.msk [vmem:[#allocation4 + $0x48] sm:$0xff] %vm309_vm1, %v428_v0 }
 0x2f8   :  { %v430_v1 = vpop.permute.xlu1 %429 }
 0x2f9   :  { %451 = vst.msk [vmem:[#allocation4 + $0x68] sm:$0xff] %vm309_vm1, %v430_v1  ;;  %v436_v2 = vpop.permute.xlu0 %435 }
 0x2fa   :  { %454 = vst.msk [vmem:[#allocation4 + $0xc8] sm:$0xff] %vm309_vm1, %v436_v2 }
 0x2fc   :  { %v438_v3 = vpop.permute.xlu1 %437 }
 0x2fd   :  { %455 = vst.msk [vmem:[#allocation4 + $0xe8] sm:$0xff] %vm309_vm1, %v438_v3  ;;  %v461_v4 = vpop.permute.xlu0 %460 }
 0x2fe   :  { %483 = vst.msk [vmem:[#allocation6 + $0x48] sm:$0xff] %vm309_vm1, %v461_v4 }
 0x300   :  { %v463_v5 = vpop.permute.xlu1 %462 }
 0x301   :  { %484 = vst.msk [vmem:[#allocation6 + $0x68] sm:$0xff] %vm309_vm1, %v463_v5  ;;  %v469_v6 = vpop.permute.xlu0 %468 }
 0x302   :  { %487 = vst.msk [vmem:[#allocation6 + $0xc8] sm:$0xff] %vm309_vm1, %v469_v6 }
 0x304   :  { %v471_v7 = vpop.permute.xlu1 %470 }
 0x305   :  { %488 = vst.msk [vmem:[#allocation6 + $0xe8] sm:$0xff] %vm309_vm1, %v471_v7  ;;  %v494_v8 = vpop.permute.xlu0 %493 }
 0x306   :  { %516 = vst.msk [vmem:[#allocation2 + $0x50] sm:$0xff] %vm309_vm1, %v494_v8 }
 0x308   :  { %v496_v9 = vpop.permute.xlu1 %495 }
 0x309   :  { %517 = vst.msk [vmem:[#allocation2 + $0x70] sm:$0xff] %vm309_vm1, %v496_v9  ;;  %v502_v10 = vpop.permute.xlu0 %501 }
 0x30a   :  { %520 = vst.msk [vmem:[#allocation2 + $0xd0] sm:$0xff] %vm309_vm1, %v502_v10 }
 0x30c   :  { %v504_v11 = vpop.permute.xlu1 %503 }
 0x30d   :  { %521 = vst.msk [vmem:[#allocation2 + $0xf0] sm:$0xff] %vm309_vm1, %v504_v11  ;;  %v527_v12 = vpop.permute.xlu0 %526 }
 0x30e   :  { %549 = vst.msk [vmem:[#allocation4 + $0x50] sm:$0xff] %vm309_vm1, %v527_v12 }
 0x310   :  { %v529_v13 = vpop.permute.xlu1 %528 }
 0x311   :  { %550 = vst.msk [vmem:[#allocation4 + $0x70] sm:$0xff] %vm309_vm1, %v529_v13  ;;  %v535_v14 = vpop.permute.xlu0 %534 }
 0x312   :  { %553 = vst.msk [vmem:[#allocation4 + $0xd0] sm:$0xff] %vm309_vm1, %v535_v14 }
 0x314   :  { %v537_v15 = vpop.permute.xlu1 %536 }
 0x315   :  { %554 = vst.msk [vmem:[#allocation4 + $0xf0] sm:$0xff] %vm309_vm1, %v537_v15  ;;  %v626_v16 = vpop.permute.xlu0 %625 }
 0x316   :  { %648 = vst.msk [vmem:[#allocation4 + $0x58] sm:$0xff] %vm309_vm1, %v626_v16 }
 0x318   :  { %v628_v17 = vpop.permute.xlu1 %627 }
 0x319   :  { %649 = vst.msk [vmem:[#allocation4 + $0x78] sm:$0xff] %vm309_vm1, %v628_v17  ;;  %v634_v18 = vpop.permute.xlu0 %633 }
 0x31a   :  { %652 = vst.msk [vmem:[#allocation4 + $0xd8] sm:$0xff] %vm309_vm1, %v634_v18 }
 0x31c   :  { %v636_v19 = vpop.permute.xlu1 %635 }
 0x31d   :  { %653 = vst.msk [vmem:[#allocation4 + $0xf8] sm:$0xff] %vm309_vm1, %v636_v19  ;;  %v560_v22 = vpop.permute.xlu0 %559 }
 0x31e   :  { %582 = vst.msk [vmem:[#allocation6 + $0x50] sm:$0xff] %vm309_vm1, %v560_v22 }
 0x320   :  { %v562_v23 = vpop.permute.xlu1 %561 }
 0x321   :  { %583 = vst.msk [vmem:[#allocation6 + $0x70] sm:$0xff] %vm309_vm1, %v562_v23  ;;  %v568_v24 = vpop.permute.xlu0 %567 }
 0x322   :  { %586 = vst.msk [vmem:[#allocation6 + $0xd0] sm:$0xff] %vm309_vm1, %v568_v24 }
 0x324   :  { %v570_v25 = vpop.permute.xlu1 %569 }
 0x325   :  { %587 = vst.msk [vmem:[#allocation6 + $0xf0] sm:$0xff] %vm309_vm1, %v570_v25  ;;  %v593_v26 = vpop.permute.xlu0 %592 }
 0x326   :  { %615 = vst.msk [vmem:[#allocation2 + $0x58] sm:$0xff] %vm309_vm1, %v593_v26 }
 0x328   :  { %v595_v27 = vpop.permute.xlu1 %594 }
 0x329   :  { %616 = vst.msk [vmem:[#allocation2 + $0x78] sm:$0xff] %vm309_vm1, %v595_v27  ;;  %v601_v30 = vpop.permute.xlu0 %600 }
 0x32a   :  { %619 = vst.msk [vmem:[#allocation2 + $0xd8] sm:$0xff] %vm309_vm1, %v601_v30 }
 0x32c   :  { %v603_v31 = vpop.permute.xlu1 %602 }
 0x32d   :  { %620 = vst.msk [vmem:[#allocation2 + $0xf8] sm:$0xff] %vm309_vm1, %v603_v31  ;;  %v659_v32 = vpop.permute.xlu0 %658 }
 0x32e   :  { %681 = vst.msk [vmem:[#allocation6 + $0x58] sm:$0xff] %vm309_vm1, %v659_v32 }
 0x32f   :  { %832 = shalt.err (!%p829_p4)
}
 0x330   :  { %s833_s18 = scalar_lea.hbm %s1402_s5, 4096 }
 0x331   :  { %p834_p5 = scmp.ne.s32.totalorder %s1402_s5, %s833_s18  ;;  %p837_p6 = scmp.lt.u32.totalorder %s833_s18, %s1402_s5 }
 0x333   :  { %p839_p7 = pnand %p837_p6, %p834_p5 }
 0x335   :  { %842 = shalt.err (!%p839_p7)
}
 0x336   :  { %s903_s23 = smov 128   ;;  %s904_s3 = smov 8   ;;  %v661_v33 = vpop.permute.xlu1 %660  ;;  %v667_v34 = vpop.permute.xlu0 %666 }
 0x337   :  { %698 = dma.vmem_to_hbm [thread:$0]  %s693_s15, 4096, %s1402_s5, [#allocation3], %s903_s23, %s903_s23, %s904_s3   ;;  %682 = vst.msk [vmem:[#allocation6 + $0x78] sm:$0xff] %vm309_vm1, %v661_v33  ;;  %685 = vst.msk [vmem:[#allocation6 + $0xd8] sm:$0xff] %vm309_vm1, %v667_v34 }
 0x338   :  { %s905_s26 = smov [#allocation4]   ;;  %s906_s2 = smov [#allocation6]  }
 0x339   :  { %s704_s1 = sshll.u32 %s905_s26, 4  ;;  %s716_s27 = sshll.u32 %s906_s2, 4  ;;  %s705_s1 = int_to_ptr.vmem [resolvable:$true] %s704_s1  ;;  %s717_s27 = int_to_ptr.vmem [resolvable:$true] %s716_s27 }
 0x33a   :  { %v331_v35 = vpop.permute.xlu1 %330  ;;  %s843_s4 = scalar_lea.vmem %s705_s1, 4096  ;;  %p848_p9 = scmp.lt.s32.totalorder %s705_s1, %s705_s1 }
 0x33b   :  { %352 = vst.msk [vmem:[#allocation4 + $0x40] sm:$0xff] %vm309_vm1, %v331_v35  ;;  %p844_p8 = scmp.ne.s32.totalorder %s705_s1, %s843_s4  ;;  %p849_p10 = scmp.lt.s32.totalorder %s843_s4, %s843_s4 }
 0x33d   :  { %p850_p11 = por %p849_p10, %p848_p9 }
 0x33f   :  { %p851_p12 = pnand %p850_p11, %p844_p8 }
 0x341   :  { %854 = shalt.err (!%p851_p12)
}
 0x342   :  { %s855_s29 = scalar_lea.hbm %s1403_s6, 4096 }
 0x343   :  { %p856_p13 = scmp.ne.s32.totalorder %s1403_s6, %s855_s29  ;;  %p859_p0 = scmp.lt.u32.totalorder %s855_s29, %s1403_s6 }
 0x345   :  { %p861_p1 = pnand %p859_p0, %p856_p13 }
 0x347   :  { %864 = shalt.err (!%p861_p1)
}
 0x348   :  { %710 = dma.vmem_to_hbm [thread:$0]  %s705_s1, 4096, %s1403_s6, [#allocation5], %s903_s23, %s903_s23, %s904_s3   ;;  %v669_v20 = vpop.permute.xlu1 %668 }
 0x349   :  { %686 = vst.msk [vmem:[#allocation6 + $0xf8] sm:$0xff] %vm309_vm1, %v669_v20  ;;  %s865_s13 = scalar_lea.vmem %s717_s27, 4096  ;;  %p870_p3 = scmp.lt.s32.totalorder %s717_s27, %s717_s27 }
 0x34a   :  { %p866_p2 = scmp.ne.s32.totalorder %s717_s27, %s865_s13  ;;  %p871_p4 = scmp.lt.s32.totalorder %s865_s13, %s865_s13 }
 0x34c   :  { %p872_p5 = por %p871_p4, %p870_p3 }
 0x34e   :  { %p873_p6 = pnand %p872_p5, %p866_p2 }
 0x350   :  { %876 = shalt.err (!%p873_p6)
}
 0x351   :  { %s877_s16 = scalar_lea.hbm %s1404_s7, 4096 }
 0x352   :  { %p878_p7 = scmp.ne.s32.totalorder %s1404_s7, %s877_s16  ;;  %p881_p8 = scmp.lt.u32.totalorder %s877_s16, %s1404_s7 }
 0x354   :  { %p883_p9 = pnand %p881_p8, %p878_p7 }
 0x356   :  { %886 = shalt.err (!%p883_p9)
}
 0x357   :  { %722 = dma.vmem_to_hbm [thread:$0]  %s717_s27, 4096, %s1404_s7, [#allocation5], %s903_s23, %s903_s23, %s904_s3  }
 0x358   :  { %887 = dma.done.wait [#allocation3], 4096  }
 0x359   :  { %888 = vsyncadd [#allocation3], 4294963200 }
 0x35a   :  { %889 = dma.done.wait [#allocation5], 8192  }
 0x35b   :  { %890 = vsyncadd [#allocation5], 4294959104 }
 0x35c   :  { %732 = vsyncpa [#allocation3], 1 }
 0x35d   :  { %733 = vsyncpa [#allocation5], 1 }

</bundles_post_ra>
